<compile_context>
chip_gen: v5e
topology: v5e:2x2
jax: 0.10.0
libtpu: 0.0.40
codegen_flags: <defaults>
</compile_context>

<pallas_src>
import functools

import jax
import jax.numpy as jnp
from jax.experimental import pallas as pl
from jax.experimental.pallas import tpu as pltpu

_LANES = 128
_SUBLANES = 8
_MAX_TILE_ROWS = 4096      # 4096 * 128 * 4 B = 2 MiB per input per grid step
_NUM_SLICES = 2            # parallel slices (uses both TCs on v7x)


def _round_up(x, m):
    return ((x + m - 1) // m) * m


def _mse_partial_kernel(s_ref, t_ref, o_ref, acc_ref):
    """Accumulates sum((s - t)^2) for one parallel slice into an (8,128) block."""
    i = pl.program_id(1)  # reduction axis (last grid dim)

    @pl.when(i == 0)
    def _():
        acc_ref[...] = jnp.zeros_like(acc_ref)

    d = s_ref[...].astype(jnp.float32) - t_ref[...].astype(jnp.float32)
    sq = d * d
    # Fold the (tile_rows, 128) tile into the (8, 128) accumulator with pure
    # VPU adds; no per-step cross-lane/sublane (XLU) reduction.
    acc_ref[...] += sq.reshape(-1, _SUBLANES, _LANES).sum(axis=0)

    @pl.when(i == pl.num_programs(1) - 1)
    def _():
        o_ref[...] = acc_ref[...]


def logits_kd_loss(out_s, out_t):
    """Pallas equivalent of Logits().forward(out_s, out_t) == F.mse_loss(out_s, out_t)."""
    assert out_s.shape == out_t.shape, (out_s.shape, out_t.shape)

    n = 1
    for dim in out_s.shape:
        n *= int(dim)
    inv_n = jnp.float32(1.0 / float(n))

    itemsize = jnp.dtype(out_s.dtype).itemsize
    # Minimum sublane multiple per dtype packing (f32: 8, bf16: 16, int8/fp8: 32).
    row_align = max(_SUBLANES, 32 // itemsize)

    # Lane-dense layout: rows of 128 elements.
    rows = pl.cdiv(n, _LANES)
    tile_rows = min(_MAX_TILE_ROWS, _round_up(pl.cdiv(rows, _NUM_SLICES), row_align))
    steps = pl.cdiv(rows, _NUM_SLICES * tile_rows)
    rows_padded = _NUM_SLICES * steps * tile_rows
    n_padded = rows_padded * _LANES

    def _prep(x):
        x = x.reshape(-1)
        if n_padded != n:
            # Both inputs are padded with zeros -> zero contribution to the loss.
            x = jnp.pad(x, (0, n_padded - n))
        return x.reshape(rows_padded, _LANES)

    s2 = _prep(out_s)
    t2 = _prep(out_t)

    # 2 inputs x 2 pipeline buffers of (tile_rows, 128), plus headroom.
    vmem_limit = int(2 * 2 * tile_rows * _LANES * itemsize + (4 << 20))

    partials = pl.pallas_call(
        _mse_partial_kernel,
        out_shape=jax.ShapeDtypeStruct((_NUM_SLICES * _SUBLANES, _LANES), jnp.float32),
        grid_spec=pltpu.PrefetchScalarGridSpec(
            num_scalar_prefetch=0,
            grid=(_NUM_SLICES, steps),
            in_specs=[
                pl.BlockSpec((tile_rows, _LANES), lambda p, i: (p * steps + i, 0)),
                pl.BlockSpec((tile_rows, _LANES), lambda p, i: (p * steps + i, 0)),
            ],
            out_specs=pl.BlockSpec((_SUBLANES, _LANES), lambda p, i: (p, 0)),
            scratch_shapes=[pltpu.VMEM((_SUBLANES, _LANES), jnp.float32)],
        ),
        compiler_params=pltpu.CompilerParams(
            dimension_semantics=("parallel", "arbitrary"),
            vmem_limit_bytes=vmem_limit,
        ),
        cost_estimate=pl.CostEstimate(
            flops=3 * n,
            transcendentals=0,
            bytes_accessed=2 * n * itemsize + _NUM_SLICES * _SUBLANES * _LANES * 4,
        ),
    )(s2, t2)

    # Tiny final reduction (2*8*128 elements) + mean scaling in plain XLA.
    return jnp.sum(partials) * inv_n


if __name__ == "__main__":
    key = jax.random.PRNGKey(0)
    ks, kt = jax.random.split(key)

    # (batch, num_classes) logits — small, class dim a multiple of 128.
    B, C = 64, 128
    out_s = jax.random.normal(ks, (B, C), dtype=jnp.float32)
    out_t = jax.random.normal(kt, (B, C), dtype=jnp.float32)

    loss = logits_kd_loss(out_s, out_t)
    jax.block_until_ready(loss)
    ref = jnp.mean((out_s - out_t) ** 2)
    assert jnp.allclose(loss, ref, rtol=1e-5, atol=1e-6), (loss, ref)

    # Non-multiple-of-128 class count exercises the lane-padding path.
    B2, C2 = 16, 1000
    s2 = jax.random.normal(ks, (B2, C2), dtype=jnp.float32)
    t2 = jax.random.normal(kt, (B2, C2), dtype=jnp.float32)
    loss2 = logits_kd_loss(s2, t2)
    jax.block_until_ready(loss2)
    ref2 = jnp.mean((s2 - t2) ** 2)
    assert jnp.allclose(loss2, ref2, rtol=1e-5, atol=1e-6), (loss2, ref2)

    print("KERNEL_OK")
</pallas_src>

<mosaic_0001>
module attributes {stable_mosaic.version = 11 : i64} {
  func.func @_mse_partial_kernel(%arg0: i32, %arg1: i32, %arg2: memref<32x128xf32, #tpu.memory_space<vmem>>, %arg3: memref<32x128xf32, #tpu.memory_space<vmem>>, %arg4: memref<8x128xf32, #tpu.memory_space<vmem>>, %arg5: memref<8x128xf32, #tpu.memory_space<vmem>>) attributes {dimension_semantics = [#tpu.dimension_semantics<parallel>, #tpu.dimension_semantics<arbitrary>], iteration_bounds = array<i64: 2, 1>, scalar_prefetch = 0 : i64, scratch_operands = 1 : i64, tpu.core_type = #tpu.core_type<tc>, window_params = [{transform_indices = @transform_0, window_bounds = array<i64: 32, 128>}, {transform_indices = @transform_1, window_bounds = array<i64: 32, 128>}, {transform_indices = @transform_2, window_bounds = array<i64: 8, 128>}]} {
    %c0_i32 = arith.constant 0 : i32
    %0 = arith.cmpi eq, %arg1, %c0_i32 : i32
    %1 = arith.extui %0 : i1 to i32
    %c0_i32_0 = arith.constant 0 : i32
    %2 = arith.cmpi ne, %1, %c0_i32_0 : i32
    scf.if %2 {
      %cst_10 = arith.constant 0.000000e+00 : f32
      %15 = vector.broadcast %cst_10 : f32 to vector<8x128xf32>
      %c0_11 = arith.constant 0 : index
      %c0_12 = arith.constant 0 : index
      %16 = vector.load %arg5[%c0_11, %c0_12] : memref<8x128xf32, #tpu.memory_space<vmem>>, vector<8x128xf32>
      tpu.vector_store %arg5[%c0_11, %c0_12], %15 {strides = array<i32>} : memref<8x128xf32, #tpu.memory_space<vmem>>, vector<8x128xf32>,
    } else {
    }
    %c0 = arith.constant 0 : index
    %c0_1 = arith.constant 0 : index
    %3 = vector.load %arg2[%c0, %c0_1] : memref<32x128xf32, #tpu.memory_space<vmem>>, vector<32x128xf32>
    %c0_2 = arith.constant 0 : index
    %c0_3 = arith.constant 0 : index
    %4 = vector.load %arg3[%c0_2, %c0_3] : memref<32x128xf32, #tpu.memory_space<vmem>>, vector<32x128xf32>
    %5 = arith.subf %3, %4 : vector<32x128xf32>
    %6 = arith.mulf %5, %5 : vector<32x128xf32>
    %c0_4 = arith.constant 0 : index
    %c0_5 = arith.constant 0 : index
    %7 = vector.load %arg5[%c0_4, %c0_5] : memref<8x128xf32, #tpu.memory_space<vmem>>, vector<8x128xf32>
    %8 = vector.shape_cast %6 : vector<32x128xf32> to vector<4x8x128xf32>
    %cst = arith.constant dense<0.000000e+00> : vector<8x128xf32>
    %9 = vector.multi_reduction <add>, %8, %cst [0] : vector<4x8x128xf32> to vector<8x128xf32>
    %10 = arith.addf %7, %9 : vector<8x128xf32>
    %c0_6 = arith.constant 0 : index
    %c0_7 = arith.constant 0 : index
    %11 = vector.load %arg5[%c0_6, %c0_7] : memref<8x128xf32, #tpu.memory_space<vmem>>, vector<8x128xf32>
    tpu.vector_store %arg5[%c0_6, %c0_7], %10 {strides = array<i32>} : memref<8x128xf32, #tpu.memory_space<vmem>>, vector<8x128xf32>,
    %c0_i32_8 = arith.constant 0 : i32
    %12 = arith.cmpi eq, %arg1, %c0_i32_8 : i32
    %13 = arith.extui %12 : i1 to i32
    %c0_i32_9 = arith.constant 0 : i32
    %14 = arith.cmpi ne, %13, %c0_i32_9 : i32
    scf.if %14 {
      %c0_10 = arith.constant 0 : index
      %c0_11 = arith.constant 0 : index
      %15 = vector.load %arg5[%c0_10, %c0_11] : memref<8x128xf32, #tpu.memory_space<vmem>>, vector<8x128xf32>
      %c0_12 = arith.constant 0 : index
      %c0_13 = arith.constant 0 : index
      %16 = vector.load %arg4[%c0_12, %c0_13] : memref<8x128xf32, #tpu.memory_space<vmem>>, vector<8x128xf32>
      tpu.vector_store %arg4[%c0_12, %c0_13], %15 {strides = array<i32>} : memref<8x128xf32, #tpu.memory_space<vmem>>, vector<8x128xf32>,
    } else {
    }
    return
  }
  func.func @transform_0(%arg0: i32, %arg1: i32) -> (i32, i32) {
    %c1_i32 = arith.constant 1 : i32
    %0 = arith.muli %arg0, %c1_i32 : i32
    %1 = arith.addi %0, %arg1 : i32
    %c0_i32 = arith.constant 0 : i32
    %c0_i32_0 = arith.constant 0 : i32
    return %1, %c0_i32 : i32, i32
  }
  func.func @transform_1(%arg0: i32, %arg1: i32) -> (i32, i32) {
    %c1_i32 = arith.constant 1 : i32
    %0 = arith.muli %arg0, %c1_i32 : i32
    %1 = arith.addi %0, %arg1 : i32
    %c0_i32 = arith.constant 0 : i32
    %c0_i32_0 = arith.constant 0 : i32
    return %1, %c0_i32 : i32, i32
  }
  func.func @transform_2(%arg0: i32, %arg1: i32) -> (i32, i32) {
    %c0_i32 = arith.constant 0 : i32
    %c0_i32_0 = arith.constant 0 : i32
    return %arg0, %c0_i32 : i32, i32
  }
}

</mosaic_0001>

<bundles_post_ra>
// kernel: tpu_custom_call.1
= control target key start
LH: loop header
LB: loop body
LE: loop exit
PB: predicated region body
PF: predicated region fallthrough
CT: control target
= control target key end

     0   :  { %7 = vsyncpa [#allocation4], 0  ;;  %s775_s0 = inlined_call_operand.hbm [shape: f32[64,128], index: 0, kind: input, shape index: {}]   ;;  %s776_s1 = inlined_call_operand.hbm [shape: f32[64,128], index: 1, kind: input, shape index: {}]   ;;  %s777_s2 = inlined_call_operand.hbm [shape: f32[16,128], index: 2, kind: output, shape index: {}]  }
   0x1   :  { %9 = vsyncpa [#allocation4 + $0x1], 0 }
   0x2   :  { %10 = vsyncpa [#allocation7], 0 }
   0x3   :  { %12 = vsyncpa [#allocation7 + $0x1], 0 }
   0x4   :  { %13 = vsyncpa [#allocation5], 0 }
   0x5   :  { %15 = vsyncpa [#allocation5 + $0x1], 0  ;;  %s633_s9 = smov 0   ;;  %s635_s10 = smov 0  }
   0x6   :  { %s637_s11 = smov 0   ;;  %s639_s12 = smov 0  }
   0x7   :  { %s641_s13 = smov 0   ;;  %s643_s14 = smov 0  }
   0x8 LB: > { %s379_s15 = sadd.s32 4294967295, %s614_s14   ;;  %s380_s16 = sadd.s32 4294967294, %s614_s14   ;;  %s614_s14 = sphi %s643_s14, %s21_s14   ;;  %s610_s13 = sphi %s641_s13, %s787_s13   ;;  %s606_s12 = sphi %s639_s12, %s786_s12   ;;  %s602_s11 = sphi %s637_s11, %s785_s11   ;;  %s598_s10 = sphi %s635_s10, %s784_s10   ;;  %s594_s9 = sphi %s633_s9, %s783_s9  }
   0x9   : > { %s33_s17 = sadd.s32 1, %s610_s13  ;;  %s42_s18 = sadd.s32 1, %s602_s11 }
   0xa   : > { %p35_p0 = scmp.ge.s32.totalorder %s33_s17, 2  ;;  %p49_p1 = scmp.ne.s32.totalorder %s602_s11, %s598_s10 }
   0xb   : > { %p50_p2 = scmp.eq.s32.totalorder %s614_s14, 0  ;;  %p55_p3 = scmp.ne.s32.totalorder %s598_s10, %s594_s9 }
   0xc   : > { %s789_s17 = smov (%p35_p0, %s33_s17), 0  ;;  %p56_p5 = scmp.eq.s32.totalorder %s379_s15, 0 }
   0xd   : > { %p674_p4 = por %p50_p2, %p49_p1  ;;  %s39_s20 = ssub.s32 %s610_s13, %s789_s17 }
   0xe   : > { %p107_p6 = scmp.eq.s32.totalorder %s379_s15, 1  ;;  %p40_p7 = scmp.eq.s32.totalorder %s39_s20, 0 }
   0xf   : > { %p680_p8 = por %p56_p5, %p55_p3  ;;  %p113_p10 = scmp.eq.s32.totalorder %s380_s16, 1 }
  0x10   : > { %p684_p9 = por %p107_p6, %p49_p1  ;;  %p382_p12 = scmp.ge.s32.totalorder %s614_s14, 2 }
  0x11   : > { %s689_s23 = scalar_select %p40_p7, %s602_s11, %s42_s18  }
  0x12   : > { %p691_p11 = por %p113_p10, %p55_p3  ;;  %p416_p13 = scmp.lt.s32.totalorder %s614_s14, 2 }
  0x13   : > { %s698_s25 = sand.u32 1, %s602_s11   ;;  %s397_s27 = sshll.u32 %s610_s13, 5 }
  0x14   : > { %s383_s26 = sshll.u32 %s698_s25, 5  ;;  %s143_s30 = scalar_lea.hbm %s775_s0, %s397_s27 }
  0x15   : > { %s137_s3 = scalar_lea.vmem [#allocation3], %s383_s26  ;;  %s144_s5 = sshll.u32 %s143_s30, 4  ;;  %s145_s5 = int_to_ptr.hbm [resolvable:$true] %s144_s5 }
  0x16   : > { %s146_s4 = sshll.u32 %s137_s3, 4  ;;  %p707_p0 = pnand %p416_p13, %p674_p4  ;;  %s147_s4 = int_to_ptr.vmem [resolvable:$true] %s146_s4 }
  0x17   : > { %p389_p1 = scmp.ge.s32.totalorder %s614_s14, 1  ;;  %s134_s7 = scalar_lea.sflag [#allocation4], %s698_s25 }
  0x18   : > { %s616_s8 = smov 128   ;;  %s617_s15 = smov 8  }
  0x19   : > { %408 = dma.hbm_to_vmem [thread:$0]  (!%p707_p0), %s145_s5, 512, %s147_s4, %s134_s7, %s616_s8, %s616_s8, %s617_s15  }
  0x1a   : > { %p177_p2 = scmp.lt.s32.totalorder %s614_s14, 3  ;;  %s166_s20 = scalar_lea.hbm %s776_s1, %s397_s27 }
  0x1b   : > { %s167_s28 = sshll.u32 %s166_s20, 4  ;;  %s160_s19 = scalar_lea.vmem [#allocation6], %s383_s26  ;;  %s168_s28 = int_to_ptr.hbm [resolvable:$true] %s167_s28 }
  0x1c   : > { %p178_p3 = pnand %p389_p1, %p177_p2  ;;  %s169_s29 = sshll.u32 %s160_s19, 4  ;;  %s170_s29 = int_to_ptr.vmem [resolvable:$true] %s169_s29 }
  0x1d   : > { %s157_s30 = scalar_lea.sflag [#allocation7], %s698_s25  ;;  %s723_s3 = sand.u32 (!%p178_p3), 1, %s598_s10  }
  0x1e   : > { %411 = dma.hbm_to_vmem [thread:$0]  (!%p707_p0), %s168_s28, 512, %s170_s29, %s157_s30, %s616_s8, %s616_s8, %s617_s15  }
  0x1f   : > { %181 = sbr.rel (%p178_p3) target bundleno = 55 (0x37), region = 28  ;;  %s390_s4 = sshll.u32 (!%p178_p3), %s723_s3, 5 }
  0x20   : > { %s184_s5 = scalar_lea.sflag (!%p178_p3), [#allocation4], %s723_s3  ;;  %s187_s7 = scalar_lea.vmem (!%p178_p3), [#allocation3], %s390_s4 }
  0x24   : > { %581 = dma.done.wait (%p680_p8), %s184_s5, 512  }
  0x25   : > { %583 = vsyncadd (%p680_p8), %s184_s5, 4294966784  ;;  %s194_s25 = scalar_lea.sflag [#allocation7], %s723_s3  ;;  %s197_s26 = scalar_lea.vmem [#allocation6], %s390_s4 }
  0x26   : > { %585 = dma.done.wait (%p680_p8), %s194_s25, 512  }
  0x27   : > { %587 = vsyncadd (%p680_p8), %s194_s25, 4294966784  ;;  %v233_v0 = vld [vmem:[%s187_s7] sm:$0xff]  ;;  %v234_v1 = vld [vmem:[%s187_s7 + $0x8] sm:$0xff]  ;;  %s392_s27 = sshll.u32 %s723_s3, 3  ;;  %s394_s6 = sshll.u32 %s606_s12, 3 }
  0x28   : > { %v235_v2 = vld [vmem:[%s187_s7 + $0x10] sm:$0xff]  ;;  %v236_v3 = vld [vmem:[%s187_s7 + $0x18] sm:$0xff]  ;;  %v237_v4 = vld [vmem:[%s197_s26] sm:$0xff]  ;;  %s271_s15 = scalar_lea.hbm %s777_s2, %s394_s6  ;;  %s223_s16 = scalar_lea.vmem [#allocation8], %s392_s27 }
  0x29   : > { %v238_v5 = vld [vmem:[%s197_s26 + $0x8] sm:$0xff]  ;;  %v239_v6 = vld [vmem:[%s197_s26 + $0x10] sm:$0xff]  ;;  %v240_v7 = vld [vmem:[%s197_s26 + $0x18] sm:$0xff]  ;;  %v241_v8 = vsub.f32 %v233_v0, %v237_v4  ;;  %s273_s18 = sshll.u32 %s223_s16, 4  ;;  %s275_s12 = sshll.u32 %s271_s15, 4  ;;  %s274_s18 = int_to_ptr.vmem [resolvable:$true] %s273_s18  ;;  %s276_s12 = int_to_ptr.hbm [resolvable:$true] %s275_s12 }
  0x2a   : > { %v242_v9 = vsub.f32 %v234_v1, %v238_v5  ;;  %v243_v10 = vsub.f32 %v235_v2, %v239_v6  ;;  %v244_v11 = vsub.f32 %v236_v3, %v240_v7  ;;  %s261_s20 = scalar_lea.sflag [#allocation5], %s723_s3  ;;  %s542_s28 = sshra.s32 %s276_s12, 4  ;;  %s543_s28 = int_to_ptr.hbm [resolvable:$true] %s542_s28 }
  0x2b   : > { %v245_v12 = vmul.f32 %v241_v8, %v241_v8  ;;  %s544_s19 = scalar_lea.hbm %s543_s28, 8  ;;  %s548_s4 = scalar_lea.hbm %s777_s2, 16 }
  0x2c   : > { %v246_v13 = vmul.f32 %v242_v9, %v242_v9  ;;  %v247_v14 = vmul.f32 %v243_v10, %v243_v10  ;;  %v248_v15 = vmul.f32 %v244_v11, %v244_v11  ;;  %p545_p4 = scmp.ne.s32.totalorder %s543_s28, %s544_s19  ;;  %p549_p7 = scmp.lt.s32.totalorder %s543_s28, %s777_s2 }
  0x2d   : > { %p550_p8 = scmp.lt.s32.totalorder %s548_s4, %s544_s19 }
  0x2e   : > { %v250_v16 = vadd.f32 %v246_v13, %v245_v12  ;;  %p546_p5 = pnand %p545_p4, %p684_p9 }
  0x2f   : > { %p551_p10 = por %p550_p8, %p549_p7 }
  0x30   : > { %v251_v17 = vadd.f32 %v250_v16, %v247_v14  ;;  %p547_p6 = pneg %p546_p5 }
  0x32   : > { %v252_v18 = vadd.f32 %v251_v17, %v248_v15  ;;  %p552_p13 = pnand %p551_p10, %p547_p6 }
  0x34   : > { %259 = vst [vmem:[%s223_s16] sm:$0xff] %v252_v18 }
  0x35   : > { %555 = shalt.err (!%p552_p13)
}
  0x36   : > { %403 = dma.vmem_to_hbm [thread:$0]  (%p684_p9), %s274_s18, 128, %s276_s12, %s261_s20  }
  0x37 PF: > { %s287_s3 = sand.u32 1, %s594_s9   ;;  %p413_p0 = pnand %p382_p12, %p691_p11 }
  0x38   : > { %s288_s25 = scalar_lea.sflag [#allocation5], %s287_s3 }
  0x39   : > { %p414_p1 = pneg %p413_p0 }
  0x3b   : > { %589 = dma.done.wait (%p414_p1), %s288_s25, 128  }
  0x3c   : > { %591 = vsyncadd (%p414_p1), %s288_s25, 4294967168  ;;  %s21_s14 = sadd.s32 1, %s614_s14   ;;  %s783_s9 = smov %s598_s10 }
  0x3d   : > { %p18_p2 = scmp.ge.s32.totalorder %s21_s14, 4   ;;  %s784_s10 = smov %s602_s11 }
  0x3e   : > { %s785_s11 = smov %s689_s23  ;;  %s786_s12 = smov %s610_s13 }
  0x3f   : > { %s787_s13 = smov %s789_s17  ;;  %20 = sbr.rel (!%p18_p2) target bundleno = 8 (0x8), region = 94 }
  0x44   :  { %294 = vsyncpa [#allocation4], 1 }
  0x45   :  { %296 = vsyncpa [#allocation4 + $0x1], 1 }
  0x46   :  { %297 = vsyncpa [#allocation7], 1 }
  0x47   :  { %299 = vsyncpa [#allocation7 + $0x1], 1 }
  0x48   :  { %300 = vsyncpa [#allocation5], 1 }
  0x49   :  { %302 = vsyncpa [#allocation5 + $0x1], 1 }

</bundles_post_ra>
